<compile_context>
chip_gen: v6e
topology: v6e:2x2x1
jax: 0.10.0
libtpu: 0.0.40
codegen_flags: <defaults>
</compile_context>

<pallas_src>
import jax
import jax.numpy as jnp
from jax.experimental import pallas as pl
from jax.experimental.pallas import tpu as pltpu

_LANE = 128
_SUBLANE = 8


def _round_up(x, m):
    return ((x + m - 1) // m) * m


def _mask_kernel(feats_ref, coords_ref, mask_ref, feats_out_ref, coords_out_ref):
    # feats_ref:  (Rt, D)  rows on sublanes, features on lanes (full-extent D)
    # coords_ref: (Rt, C)  rows on sublanes, C (=3) on lanes (full-extent C)
    # mask_ref:   (Rt, 1)  per-row keep flag, broadcast over lanes
    keep = mask_ref[...] != 0                       # (Rt, 1) bool

    f = feats_ref[...]
    feats_out_ref[...] = jnp.where(keep, f, 0).astype(feats_out_ref.dtype)

    c = coords_ref[...]
    coords_out_ref[...] = jnp.where(keep, c, 0).astype(coords_out_ref.dtype)


class MolecularGenerator:
    """JAX/Pallas stand-in for the abstract PyTorch MolecularGenerator."""

    def __init__(self, **kwargs):
        self._hparams = kwargs

    @property
    def hparams(self):
        return self._hparams

    def forward(self, coords, inv_feats, edge_feats=None, cond_coords=None,
                cond_atomics=None, cond_bonds=None, atom_mask=None):
        B, N, C = coords.shape
        D = inv_feats.shape[-1]
        rows = B * N

        if atom_mask is None:
            atom_mask = jnp.ones((B, N), dtype=inv_feats.dtype)

        # Natural layouts, no copies: reshape only (contiguous -> metadata op).
        feats_flat = inv_feats.reshape(rows, D)
        coords_flat = coords.reshape(rows, C)
        mask_col = atom_mask.reshape(rows, 1).astype(inv_feats.dtype)

        # --- row tile from a full per-operand VMEM accounting ---------------
        # Every operand's last dim is lane-padded to 128 in VMEM; count
        # feats in+out, coords in+out, mask in, and x2 for double buffering.
        it_f = jnp.dtype(inv_feats.dtype).itemsize
        it_c = jnp.dtype(coords.dtype).itemsize
        it_m = jnp.dtype(mask_col.dtype).itemsize
        d_lanes = _round_up(D, _LANE)
        c_lanes = _round_up(C, _LANE)
        per_row_bytes = 2 * d_lanes * it_f + 2 * c_lanes * it_c + _LANE * it_m

        vmem_budget = 24 * 1024 * 1024              # live tile data (all buffers)
        budget_rows = max(_SUBLANE,
                          (vmem_budget // (2 * per_row_bytes)) // _SUBLANE * _SUBLANE)

        if rows <= 2 * _SUBLANE:
            # Single full-extent block (no (8,128) divisibility constraint).
            row_tile = rows
        else:
            # >= 2 grid steps so the parallel axis can use both v7x TensorCores.
            half = _round_up(-(-rows // 2), _SUBLANE)
            row_tile = max(_SUBLANE, min(budget_rows, half))

        grid = (pl.cdiv(rows, row_tile),)           # ragged last block is fine:
                                                    # OOB writes are dropped.

        feats_out, coords_out = pl.pallas_call(
            _mask_kernel,
            out_shape=(
                jax.ShapeDtypeStruct((rows, D), inv_feats.dtype),
                jax.ShapeDtypeStruct((rows, C), coords.dtype),
            ),
            grid=grid,
            in_specs=[
                pl.BlockSpec((row_tile, D), lambda i: (i, 0)),   # feats
                pl.BlockSpec((row_tile, C), lambda i: (i, 0)),   # coords
                pl.BlockSpec((row_tile, 1), lambda i: (i, 0)),   # mask column
            ],
            out_specs=(
                pl.BlockSpec((row_tile, D), lambda i: (i, 0)),
                pl.BlockSpec((row_tile, C), lambda i: (i, 0)),
            ),
            compiler_params=pltpu.CompilerParams(
                dimension_semantics=("parallel",),
                vmem_limit_bytes=48 * 1024 * 1024,   # <= 48 MiB: safe on v7x's
                                                     # 64 MiB/TC, v5e/v6e 128 MiB
            ),
        )(feats_flat, coords_flat, mask_col)

        return coords_out.reshape(B, N, C), feats_out.reshape(B, N, D)

    __call__ = forward


if __name__ == "__main__":
    key = jax.random.PRNGKey(0)
    k_coords, k_feats = jax.random.split(key, 2)

    # Small shapes; rows = 120 exercises the ragged last block (row_tile = 64)
    # and D = 96 exercises a non-128-multiple, full-extent feature dim.
    B, N, C, D = 2, 60, 3, 96
    coords = jax.random.normal(k_coords, (B, N, C), dtype=jnp.float32)
    inv_feats = jax.random.normal(k_feats, (B, N, D), dtype=jnp.float32)
    # Deterministic mask: last 7 atoms of each molecule are padding.
    atom_mask = jnp.concatenate(
        [jnp.ones((B, N - 7), jnp.float32), jnp.zeros((B, 7), jnp.float32)],
        axis=1,
    )

    model = MolecularGenerator(d_model=D, n_atoms=N)
    coords_out, feats_out = model(coords, inv_feats, atom_mask=atom_mask)
    jax.block_until_ready((coords_out, feats_out))

    # Correctness check against plain-JAX reference (where-form: NaN-safe).
    keep = (atom_mask != 0)[:, :, None]
    ref_coords = jnp.where(keep, coords, 0.0)
    ref_feats = jnp.where(keep, inv_feats, 0.0)
    assert coords_out.shape == ref_coords.shape and feats_out.shape == ref_feats.shape
    assert jnp.allclose(coords_out, ref_coords), "coords mismatch"
    assert jnp.allclose(feats_out, ref_feats), "feats mismatch"

    print("KERNEL_OK")
</pallas_src>

<mosaic_0001>
module attributes {stable_mosaic.version = 11 : i64} {
  func.func @_mask_kernel(%arg0: i32, %arg1: memref<64x96xf32, #tpu.memory_space<vmem>>, %arg2: memref<64x3xf32, #tpu.memory_space<vmem>>, %arg3: memref<64x1xf32, #tpu.memory_space<vmem>>, %arg4: memref<64x96xf32, #tpu.memory_space<vmem>>, %arg5: memref<64x3xf32, #tpu.memory_space<vmem>>) attributes {dimension_semantics = [#tpu.dimension_semantics<parallel>], iteration_bounds = array<i64: 2>, scalar_prefetch = 0 : i64, scratch_operands = 0 : i64, tpu.core_type = #tpu.core_type<tc>, window_params = [{transform_indices = @transform_0, window_bounds = array<i64: 64, 96>}, {transform_indices = @transform_1, window_bounds = array<i64: 64, 3>}, {transform_indices = @transform_2, window_bounds = array<i64: 64, 1>}, {transform_indices = @transform_3, window_bounds = array<i64: 64, 96>}, {transform_indices = @transform_4, window_bounds = array<i64: 64, 3>}]} {
    %c0 = arith.constant 0 : index
    %c0_0 = arith.constant 0 : index
    %0 = vector.load %arg3[%c0, %c0_0] : memref<64x1xf32, #tpu.memory_space<vmem>>, vector<64x1xf32>
    %cst = arith.constant 0.000000e+00 : f32
    %1 = vector.broadcast %cst : f32 to vector<64x1xf32>
    %2 = arith.cmpf one, %0, %1 : vector<64x1xf32>
    %c0_1 = arith.constant 0 : index
    %c0_2 = arith.constant 0 : index
    %3 = vector.load %arg1[%c0_1, %c0_2] : memref<64x96xf32, #tpu.memory_space<vmem>>, vector<64x96xf32>
    %c0_i32 = arith.constant 0 : i32
    %4 = arith.sitofp %c0_i32 : i32 to f32
    %5 = vector.shape_cast %2 : vector<64x1xi1> to vector<64x1xi1>
    %6 = vector.broadcast %5 : vector<64x1xi1> to vector<64x96xi1>
    %7 = vector.broadcast %4 : f32 to vector<64x96xf32>
    %8 = arith.select %6, %3, %7 : vector<64x96xi1>, vector<64x96xf32>
    %c0_3 = arith.constant 0 : index
    %c0_4 = arith.constant 0 : index
    %9 = vector.load %arg4[%c0_3, %c0_4] : memref<64x96xf32, #tpu.memory_space<vmem>>, vector<64x96xf32>
    tpu.vector_store %arg4[%c0_3, %c0_4], %8 {strides = array<i32>} : memref<64x96xf32, #tpu.memory_space<vmem>>, vector<64x96xf32>,
    %c0_5 = arith.constant 0 : index
    %c0_6 = arith.constant 0 : index
    %10 = vector.load %arg2[%c0_5, %c0_6] : memref<64x3xf32, #tpu.memory_space<vmem>>, vector<64x3xf32>
    %c0_i32_7 = arith.constant 0 : i32
    %11 = arith.sitofp %c0_i32_7 : i32 to f32
    %12 = vector.shape_cast %2 : vector<64x1xi1> to vector<64x1xi1>
    %13 = vector.broadcast %12 : vector<64x1xi1> to vector<64x3xi1>
    %14 = vector.broadcast %11 : f32 to vector<64x3xf32>
    %15 = arith.select %13, %10, %14 : vector<64x3xi1>, vector<64x3xf32>
    %c0_8 = arith.constant 0 : index
    %c0_9 = arith.constant 0 : index
    %16 = vector.load %arg5[%c0_8, %c0_9] : memref<64x3xf32, #tpu.memory_space<vmem>>, vector<64x3xf32>
    tpu.vector_store %arg5[%c0_8, %c0_9], %15 {strides = array<i32>} : memref<64x3xf32, #tpu.memory_space<vmem>>, vector<64x3xf32>,
    return
  }
  func.func @transform_0(%arg0: i32) -> (i32, i32) {
    %c0_i32 = arith.constant 0 : i32
    %c0_i32_0 = arith.constant 0 : i32
    return %arg0, %c0_i32 : i32, i32
  }
  func.func @transform_1(%arg0: i32) -> (i32, i32) {
    %c0_i32 = arith.constant 0 : i32
    %c0_i32_0 = arith.constant 0 : i32
    return %arg0, %c0_i32 : i32, i32
  }
  func.func @transform_2(%arg0: i32) -> (i32, i32) {
    %c0_i32 = arith.constant 0 : i32
    %c0_i32_0 = arith.constant 0 : i32
    return %arg0, %c0_i32 : i32, i32
  }
  func.func @transform_3(%arg0: i32) -> (i32, i32) {
    %c0_i32 = arith.constant 0 : i32
    %c0_i32_0 = arith.constant 0 : i32
    return %arg0, %c0_i32 : i32, i32
  }
  func.func @transform_4(%arg0: i32) -> (i32, i32) {
    %c0_i32 = arith.constant 0 : i32
    %c0_i32_0 = arith.constant 0 : i32
    return %arg0, %c0_i32 : i32, i32
  }
}

</mosaic_0001>

<bundles_post_ra>
// kernel: tpu_custom_call.1
= control target key start
LH: loop header
LB: loop body
LE: loop exit
PB: predicated region body
PF: predicated region fallthrough
CT: control target
= control target key end

     0   :  { %s1293_s15 = smov 0   ;;  %s1295_s16 = smov 0   ;;  %s1510_s0 = inlined_call_operand.vmem [shape: f32[120,96], index: 0, kind: input, shape index: {}]   ;;  %s1511_s1 = inlined_call_operand.vmem [shape: f32[120,3], index: 1, kind: input, shape index: {}]   ;;  %s1512_s2 = inlined_call_operand.vmem [shape: f32[120,1], index: 2, kind: input, shape index: {}]   ;;  %s1513_s3 = inlined_call_operand.vmem [shape: f32[120,96], index: 3, kind: output, shape index: {0}]   ;;  %s1514_s4 = inlined_call_operand.vmem [shape: f32[120,3], index: 4, kind: output, shape index: {1}]  }
   0x1   :  { %s1297_s17 = smov 0  }
   0x2 LB: > { %s1306_s18 = sadd.s32 4294967295, %s1201_s17   ;;  %s1308_s19 = sadd.s32 1, %s1201_s17   ;;  %s1201_s17 = sphi %s1297_s17, %s1524_s17   ;;  %s1197_s16 = sphi %s1295_s16, %s1523_s16   ;;  %s1193_s15 = sphi %s1293_s15, %s1522_s15  }
   0x3   : > { %s97_s20 = ssub.s32 %s1201_s17, %s1308_s19  ;;  %s100_s21 = sadd.s32 1, %s1197_s16 }
   0x4   : > { %p98_p0 = scmp.eq.s32.totalorder %s97_s20, 0  ;;  %p110_p1 = scmp.ne.s32.totalorder %s1197_s16, %s1193_s15 }
   0x5   : > { %p111_p2 = scmp.eq.s32.totalorder %s1306_s18, 1  ;;  %p913_p3 = scmp.ge.s32.totalorder %s1201_s17, 1 }
   0x6   : > { %s1316_s22 = scalar_select %p98_p0, %s1197_s16, %s100_s21  }
   0x7   : > { %p1318_p4 = por %p111_p2, %p110_p1  ;;  %p212_p5 = scmp.lt.s32.totalorder %s1201_s17, 3 }
   0x9   : > { %p213_p6 = pnand %p913_p3, %p212_p5 }
   0xa   : > { %s1323_s24 = sshll.u32 (!%p213_p6), %s1306_s18, 3  ;;  %s254_s30 = sand.u32 (!%p213_p6), 1, %s1193_s15  }
   0xb   : > { %216 = sbr.rel (%p213_p6) target bundleno = 246 (0xf6), region = 32  ;;  %p268_p7 = scmp.lt.s32.totalorder (!%p213_p6), %s1323_s24, 14 }
   0xc   : > { %s914_s11 = sshll.u32 (!%p213_p6), %s254_s30, 6 }
   0xd   : > { %s1351_s12 = scalar_lea.vmem (!%p213_p6), [#allocation2], %s914_s11   ;;  %s1355_s13 = scalar_lea.vmem (!%p213_p6), [#allocation3], %s914_s11  }
  0x10   : > { %v1267_v0 = vmov 0   ;;  %s269_s25 = scalar_select %p268_p7, %s1323_s24, 14  ;;  %vm387_vm8 = vcmask 785408   ;;  %vm412_vm9 = vcmask 23552  }
  0x11   : > { %1114 = vset.pattern.permute.xlu1 %v1267_v0  ;;  %1113 = vset.pattern.permute.xlu0 %v1267_v0  ;;  %s433_s14 = ssub.s32 (%p1318_p4), 15, %s1323_s24  ;;  %s954_s15 = sshll.u32 (%p1318_p4), %s1306_s18, 6 }
  0x12   : > { %s1327_s26 = sshll.u32 %s269_s25, 3  ;;  %p434_p8 = scmp.lt.s32.totalorder (%p1318_p4), %s433_s14, 8 }
  0x13   : > { %s299_s29 = scalar_lea.vmem %s1512_s2, %s1327_s26  ;;  %s1338_s7 = scalar_lea.vmem %s1510_s0, %s1327_s26 }
  0x14   : > { %v317_v1 = vld [vmem:[%s299_s29 + $0x10] sm:$0xff]  ;;  %v315_v2 = vld [vmem:[%s299_s29] sm:$0xff]  ;;  %v318_v3 = vld [vmem:[%s299_s29 + $0x18] sm:$0xff]  ;;  %s1344_s10 = scalar_lea.vmem %s1511_s1, %s1327_s26  ;;  %s1405_s21 = scalar_lea.vmem (%p1318_p4), %s1513_s3, %s954_s15  }
  0x15   : > { %vm325_vm0 = vcmp.ne.f32.partialorder %v317_v1, 0.0  ;;  %vm323_vm1 = vcmp.ne.f32.partialorder %v315_v2, 0.0  ;;  %vm326_vm2 = vcmp.ne.f32.partialorder %v318_v3, 0.0  ;;  %v316_v4 = vld [vmem:[%s299_s29 + $0x8] sm:$0xff]  ;;  %v319_v8 = vld [vmem:[%s299_s29 + $0x20] sm:$0xff]  ;;  %v322_v11 = vld [vmem:[%s299_s29 + $0x38] sm:$0xff] }
  0x16   : > { %v341_v5 = vsel %vm325_vm0, 1, %v1267_v0  ;;  %v339_v6 = vsel %vm323_vm1, 1, %v1267_v0  ;;  %vm324_vm3 = vcmp.ne.f32.partialorder %v316_v4, 0.0  ;;  %v320_v7 = vld [vmem:[%s299_s29 + $0x28] sm:$0xff]  ;;  %v342_v9 = vsel %vm326_vm2, 1, %v1267_v0  ;;  %v321_v12 = vld [vmem:[%s299_s29 + $0x30] sm:$0xff] }
  0x17   : > { %354 = vperm.xlu1 %1114, %v341_v5   ;;  %348 = vperm.xlu0 %1113, %v339_v6   ;;  %v340_v10 = vsel %vm324_vm3, 1, %v1267_v0  ;;  %vm328_vm4 = vcmp.ne.f32.partialorder %v320_v7, 0.0  ;;  %vm327_vm5 = vcmp.ne.f32.partialorder %v319_v8, 0.0  ;;  %vm330_vm6 = vcmp.ne.f32.partialorder %v322_v11, 0.0  ;;  %v333_v17 = vld [vmem:[%s1338_s7 + $0x10] sm:$0xff]  ;;  %v331_v19 = vld [vmem:[%s1338_s7] sm:$0xff] }
  0x18   : > { %v344_v13 = vsel %vm328_vm4, 1, %v1267_v0  ;;  %v343_v14 = vsel %vm327_vm5, 1, %v1267_v0  ;;  %vm329_vm7 = vcmp.ne.f32.partialorder %v321_v12, 0.0  ;;  %v346_v15 = vsel %vm330_vm6, 1, %v1267_v0  ;;  %v398_v18 = vld [vmem:[%s1344_s10 + $0x10] sm:$0xff]  ;;  %v396_v20 = vld [vmem:[%s1344_s10] sm:$0xff] }
  0x19   : > { %v345_v16 = vsel %vm329_vm7, 1, %v1267_v0  ;;  %v334_v27 = vld [vmem:[%s1338_s7 + $0x18] sm:$0xff]  ;;  %v332_v29 = vld [vmem:[%s1338_s7 + $0x8] sm:$0xff]  ;;  %v335_v39 = vld [vmem:[%s1338_s7 + $0x20] sm:$0xff] }
  0x1a   : > { %v399_v28 = vld [vmem:[%s1344_s10 + $0x18] sm:$0xff]  ;;  %v397_v30 = vld [vmem:[%s1344_s10 + $0x8] sm:$0xff]  ;;  %v400_v40 = vld [vmem:[%s1344_s10 + $0x20] sm:$0xff] }
  0x1b   : > { %357 = vperm.xlu1 %1114, %v342_v9   ;;  %351 = vperm.xlu0 %1113, %v340_v10   ;;  %v336_v37 = vld [vmem:[%s1338_s7 + $0x28] sm:$0xff]  ;;  %v338_v47 = vld [vmem:[%s1338_s7 + $0x38] sm:$0xff]  ;;  %v337_v49 = vld [vmem:[%s1338_s7 + $0x30] sm:$0xff] }
  0x1c   : > { %v401_v38 = vld [vmem:[%s1344_s10 + $0x28] sm:$0xff]  ;;  %v403_v48 = vld [vmem:[%s1344_s10 + $0x38] sm:$0xff]  ;;  %v402_v50 = vld [vmem:[%s1344_s10 + $0x30] sm:$0xff] }
  0x1f   : > { %363 = vperm.xlu1 %1114, %v344_v13   ;;  %360 = vperm.xlu0 %1113, %v343_v14  }
  0x23   : > { %369 = vperm.xlu1 %1114, %v346_v15   ;;  %366 = vperm.xlu0 %1113, %v345_v16  }
  0x92   : > { %v355_v21 = vpop.permute.xlu1 %354  ;;  %v349_v22 = vpop.permute.xlu0 %348 }
  0x93   : > { %vm373_vm10 = vcmp.eq.s32.totalorder %v355_v21, 1  ;;  %vm371_vm11 = vcmp.eq.s32.totalorder %v349_v22, 1 }
  0x94   : > { %v381_v23 = vsel %vm373_vm10, %v333_v17, 0.0  ;;  %v406_v24 = vsel %vm373_vm10, %v398_v18, 0.0  ;;  %v379_v25 = vsel %vm371_vm11, %v331_v19, 0.0  ;;  %v404_v26 = vsel %vm371_vm11, %v396_v20, 0.0 }
  0x95   : > { %390 = vst.msk [vmem:[%s1351_s12 + $0x10] sm:$0xff] %vm387_vm8, %v381_v23  ;;  %388 = vst.msk [vmem:[%s1351_s12] sm:$0xff] %vm387_vm8, %v379_v25 }
  0x96   : > { %415 = vst.msk [vmem:[%s1355_s13 + $0x10] sm:$0xff] %vm412_vm9, %v406_v24  ;;  %413 = vst.msk [vmem:[%s1355_s13] sm:$0xff] %vm412_vm9, %v404_v26  ;;  %v358_v31 = vpop.permute.xlu1 %357  ;;  %v352_v32 = vpop.permute.xlu0 %351 }
  0x97   : > { %vm374_vm12 = vcmp.eq.s32.totalorder %v358_v31, 1  ;;  %vm372_vm13 = vcmp.eq.s32.totalorder %v352_v32, 1 }
  0x98   : > { %v382_v33 = vsel %vm374_vm12, %v334_v27, 0.0  ;;  %v407_v34 = vsel %vm374_vm12, %v399_v28, 0.0  ;;  %v380_v35 = vsel %vm372_vm13, %v332_v29, 0.0  ;;  %v405_v36 = vsel %vm372_vm13, %v397_v30, 0.0 }
  0x99   : > { %391 = vst.msk [vmem:[%s1351_s12 + $0x18] sm:$0xff] %vm387_vm8, %v382_v33  ;;  %389 = vst.msk [vmem:[%s1351_s12 + $0x8] sm:$0xff] %vm387_vm8, %v380_v35 }
  0x9a   : > { %416 = vst.msk [vmem:[%s1355_s13 + $0x18] sm:$0xff] %vm412_vm9, %v407_v34  ;;  %414 = vst.msk [vmem:[%s1355_s13 + $0x8] sm:$0xff] %vm412_vm9, %v405_v36  ;;  %v364_v41 = vpop.permute.xlu1 %363  ;;  %v361_v42 = vpop.permute.xlu0 %360 }
  0x9b   : > { %vm376_vm14 = vcmp.eq.s32.totalorder %v364_v41, 1  ;;  %vm375_vm15 = vcmp.eq.s32.totalorder %v361_v42, 1 }
  0x9c   : > { %v384_v43 = vsel %vm376_vm14, %v336_v37, 0.0  ;;  %v409_v44 = vsel %vm376_vm14, %v401_v38, 0.0  ;;  %v383_v45 = vsel %vm375_vm15, %v335_v39, 0.0  ;;  %v408_v46 = vsel %vm375_vm15, %v400_v40, 0.0 }
  0x9d   : > { %393 = vst.msk [vmem:[%s1351_s12 + $0x28] sm:$0xff] %vm387_vm8, %v384_v43  ;;  %392 = vst.msk [vmem:[%s1351_s12 + $0x20] sm:$0xff] %vm387_vm8, %v383_v45 }
  0x9e   : > { %418 = vst.msk [vmem:[%s1355_s13 + $0x28] sm:$0xff] %vm412_vm9, %v409_v44  ;;  %417 = vst.msk [vmem:[%s1355_s13 + $0x20] sm:$0xff] %vm412_vm9, %v408_v46  ;;  %v370_v51 = vpop.permute.xlu1 %369  ;;  %v367_v52 = vpop.permute.xlu0 %366  ;;  %431 = sbr.rel (!%p1318_p4) target bundleno = 202 (0xca), region = 36 }
  0x9f   : > { %vm378_vm0 = vcmp.eq.s32.totalorder %v370_v51, 1  ;;  %vm377_vm1 = vcmp.eq.s32.totalorder %v367_v52, 1 }
  0xa0   : > { %v386_v53 = vsel %vm378_vm0, %v338_v47, 0.0  ;;  %v411_v54 = vsel %vm378_vm0, %v403_v48, 0.0  ;;  %v385_v55 = vsel %vm377_vm1, %v337_v49, 0.0  ;;  %v410_v56 = vsel %vm377_vm1, %v402_v50, 0.0 }
  0xa1   : > { %395 = vst.msk [vmem:[%s1351_s12 + $0x38] sm:$0xff] %vm387_vm8, %v386_v53  ;;  %394 = vst.msk [vmem:[%s1351_s12 + $0x30] sm:$0xff] %vm387_vm8, %v385_v55 }
  0xa2   : > { %420 = vst.msk [vmem:[%s1355_s13 + $0x38] sm:$0xff] %vm412_vm9, %v411_v54  ;;  %419 = vst.msk [vmem:[%s1355_s13 + $0x30] sm:$0xff] %vm412_vm9, %v410_v56 }
  0xa3   : > { %s1526_s14 = smov (!%p434_p8, %s433_s14), 8 }
  0xa4   : > { %s925_s25 = sshll.u32 %s1526_s14, 7 }
  0xa5   : > { %p928_p9 = scmp.eq.s32.totalorder %s925_s25, 0 }
  0xa6   : > { %s1411_s26 = sshrl.u32 (!%p928_p9), %s1526_s14, 3 }
  0xa7   : > { %442 = sbr.rel (%p928_p9) target bundleno = 202 (0xca), region = 40  ;;  %p929_p10 = scmp.le.s32.totalorder (!%p928_p9), %s1411_s26, 0 }
  0xac   : > { %817 = sbr.rel (%p929_p10) target bundleno = 185 (0xb9), region = 194  ;;  %s1516_s27 = smov (!%p929_p10), %s1405_s21 }
  0xad   : > { %s1517_s28 = smov (!%p929_p10), %s1351_s12  ;;  %s1420_s29 = smov (!%p929_p10), 0  }
  0xae   : > { %s1422_s30 = smov (!%p929_p10), 0  }
  0xb1 LB: >> { %v519_v57 = vld [vmem:[%s1209_s28] sm:$0xff]  ;;  %v521_v58 = vld [vmem:[%s1209_s28 + $0x8] sm:$0xff]  ;;  %v523_v59 = vld [vmem:[%s1209_s28 + $0x10] sm:$0xff]  ;;  %s535_s5 = sadd.s32 1, %s1213_s29  ;;  %s513_s30 = sadd.s32 1, %s1217_s30   ;;  %s1217_s30 = sphi %s1422_s30, %s513_s30   ;;  %s1213_s29 = sphi %s1420_s29, %s1518_s29   ;;  %s1209_s28 = sphi %s1517_s28, %s540_s28   ;;  %s1205_s27 = sphi %s1516_s27, %s541_s27  }
  0xb2   : >> { %520 = vst [vmem:[%s1205_s27] sm:$0xff] %v519_v57  ;;  %522 = vst [vmem:[%s1205_s27 + $0x8] sm:$0xff] %v521_v58  ;;  %v525_v60 = vld [vmem:[%s1209_s28 + $0x18] sm:$0xff]  ;;  %v527_v61 = vld [vmem:[%s1209_s28 + $0x20] sm:$0xff]  ;;  %p536_p11 = scmp.ge.s32.totalorder %s535_s5, %s1411_s26  ;;  %p512_p12 = scmp.ge.s32.totalorder %s513_s30, %s1411_s26 }
  0xb3   : >> { %524 = vst [vmem:[%s1205_s27 + $0x10] sm:$0xff] %v523_v59  ;;  %v529_v62 = vld [vmem:[%s1209_s28 + $0x28] sm:$0xff]  ;;  %526 = vst [vmem:[%s1205_s27 + $0x18] sm:$0xff] %v525_v60  ;;  %v531_v63 = vld [vmem:[%s1209_s28 + $0x30] sm:$0xff] }
  0xb4   : >> { %528 = vst [vmem:[%s1205_s27 + $0x20] sm:$0xff] %v527_v61  ;;  %530 = vst [vmem:[%s1205_s27 + $0x28] sm:$0xff] %v529_v62  ;;  %v533_v0 = vld [vmem:[%s1209_s28 + $0x38] sm:$0xff]  ;;  %s1528_s5 = smov (%p536_p11, %s535_s5), 0  ;;  %515 = sbr.rel (!%p512_p12) target bundleno = 177 (0xb1), region = 200 }
  0xb5   : >> { %532 = vst [vmem:[%s1205_s27 + $0x30] sm:$0xff] %v531_v63  ;;  %534 = vst [vmem:[%s1205_s27 + $0x38] sm:$0xff] %v533_v0  ;;  %s930_s6 = sshll.u32 %s1528_s5, 6  ;;  %s1518_s29 = smov %s1528_s5 }
  0xb6   : >> { %s540_s28 = scalar_lea.vmem %s1351_s12, %s930_s6 [#allocation2]   ;;  %s541_s27 = scalar_lea.vmem %s1405_s21, %s930_s6  }
  0xb9 PF: > { %s1441_s7 = sand.u32 7, %s1526_s14   ;;  %s955_s8 = sshll.u32 %s1411_s26, 6 }
  0xba   : > { %s546_s9 = scalar_lea.vmem %s1351_s12, %s955_s8 [#allocation2]   ;;  %s548_s10 = scalar_lea.vmem %s1405_s21, %s955_s8  }
  0xbb   : > { %p935_p13 = scmp.le.s32.totalorder %s1441_s7, 0 }
  0xbc   : > { %s1219_s11 = smov (!%p935_p13), %s548_s10   ;;  %s1223_s15 = smov (!%p935_p13), %s546_s9  }
  0xbd   : > { %831 = sbr.rel (%p935_p13) target bundleno = 202 (0xca), region = 205  ;;  %s1227_s17 = smov (!%p935_p13), 0  }
  0xbe   : > { %s1231_s20 = smov (!%p935_p13), 0  }
  0xc2 LB: >> { %v558_v1 = vld [vmem:[%s1225_s15] sm:$0xff]  ;;  %s560_s14 = sadd.s32 1, %s1229_s17  ;;  %s552_s20 = sadd.s32 1, %s1233_s20   ;;  %s1233_s20 = sphi %s1231_s20, %s552_s20   ;;  %s1229_s17 = sphi %s1227_s17, %s1228_s17   ;;  %s1225_s15 = sphi %s1223_s15, %s565_s15   ;;  %s1221_s11 = sphi %s1219_s11, %s566_s11  }
  0xc3   : >> { %559 = vst [vmem:[%s1221_s11] sm:$0xff] %v558_v1  ;;  %p561_p0 = scmp.ge.s32.totalorder %s560_s14, %s1441_s7  ;;  %p551_p1 = scmp.ge.s32.totalorder %s552_s20, %s1441_s7 }
  0xc5   : >> { %s1530_s14 = smov (%p561_p0, %s560_s14), 0  ;;  %554 = sbr.rel (!%p551_p1) target bundleno = 194 (0xc2), region = 211 }
  0xc6   : >> { %s936_s12 = sshll.u32 %s1530_s14, 3  ;;  %s1228_s17 = smov %s1530_s14  }
  0xc7   : >> { %s565_s15 = scalar_lea.vmem %s546_s9, %s936_s12 [#allocation2]   ;;  %s566_s11 = scalar_lea.vmem %s548_s10, %s936_s12  }
  0xca PF: > { %572 = sbr.rel (!%p1318_p4) target bundleno = 246 (0xf6), region = 88  ;;  %s574_s21 = ssub.s32 (%p1318_p4), 15, %s1323_s24 }
  0xcb   : > { %s957_s25 = sshll.u32 (%p1318_p4), %s1306_s18, 6  ;;  %p575_p2 = scmp.lt.s32.totalorder (%p1318_p4), %s574_s21, 8 }
  0xcc   : > { %s1456_s28 = scalar_lea.vmem (%p1318_p4), %s1514_s4, %s957_s25  }
  0xcf   : > { %s1532_s21 = smov (!%p575_p2, %s574_s21), 8 }
  0xd0   : > { %s939_s29 = sshll.u32 %s1532_s21, 7 }
  0xd1   : > { %p942_p3 = scmp.eq.s32.totalorder %s939_s29, 0 }
  0xd2   : > { %s1462_s30 = sshrl.u32 (!%p942_p3), %s1532_s21, 3 }
  0xd3   : > { %583 = sbr.rel (%p942_p3) target bundleno = 246 (0xf6), region = 92  ;;  %p943_p4 = scmp.le.s32.totalorder (!%p942_p3), %s1462_s30, 0 }
  0xd8   : > { %845 = sbr.rel (%p943_p4) target bundleno = 229 (0xe5), region = 216  ;;  %s1519_s18 = smov (!%p943_p4), %s1456_s28 }
  0xd9   : > { %s1520_s23 = smov (!%p943_p4), %s1355_s13  ;;  %s1471_s24 = smov (!%p943_p4), 0  }
  0xda   : > { %s1473_s5 = smov (!%p943_p4), 0  }
  0xdd LB: >> { %v660_v2 = vld [vmem:[%s1241_s23] sm:$0xff]  ;;  %v662_v3 = vld [vmem:[%s1241_s23 + $0x8] sm:$0xff]  ;;  %v664_v4 = vld [vmem:[%s1241_s23 + $0x10] sm:$0xff]  ;;  %s676_s6 = sadd.s32 1, %s1245_s24  ;;  %s654_s5 = sadd.s32 1, %s1249_s5   ;;  %s1249_s5 = sphi %s1473_s5, %s654_s5   ;;  %s1245_s24 = sphi %s1471_s24, %s1521_s24   ;;  %s1241_s23 = sphi %s1520_s23, %s681_s23   ;;  %s1237_s18 = sphi %s1519_s18, %s682_s18  }
  0xde   : >> { %661 = vst [vmem:[%s1237_s18] sm:$0xff] %v660_v2  ;;  %663 = vst [vmem:[%s1237_s18 + $0x8] sm:$0xff] %v662_v3  ;;  %v666_v5 = vld [vmem:[%s1241_s23 + $0x18] sm:$0xff]  ;;  %v668_v6 = vld [vmem:[%s1241_s23 + $0x20] sm:$0xff]  ;;  %p677_p5 = scmp.ge.s32.totalorder %s676_s6, %s1462_s30  ;;  %p653_p6 = scmp.ge.s32.totalorder %s654_s5, %s1462_s30 }
  0xdf   : >> { %665 = vst [vmem:[%s1237_s18 + $0x10] sm:$0xff] %v664_v4  ;;  %v670_v7 = vld [vmem:[%s1241_s23 + $0x28] sm:$0xff]  ;;  %667 = vst [vmem:[%s1237_s18 + $0x18] sm:$0xff] %v666_v5  ;;  %v672_v8 = vld [vmem:[%s1241_s23 + $0x30] sm:$0xff] }
  0xe0   : >> { %669 = vst [vmem:[%s1237_s18 + $0x20] sm:$0xff] %v668_v6  ;;  %671 = vst [vmem:[%s1237_s18 + $0x28] sm:$0xff] %v670_v7  ;;  %v674_v9 = vld [vmem:[%s1241_s23 + $0x38] sm:$0xff]  ;;  %s1534_s6 = smov (%p677_p5, %s676_s6), 0  ;;  %656 = sbr.rel (!%p653_p6) target bundleno = 221 (0xdd), region = 222 }
  0xe1   : >> { %673 = vst [vmem:[%s1237_s18 + $0x30] sm:$0xff] %v672_v8  ;;  %675 = vst [vmem:[%s1237_s18 + $0x38] sm:$0xff] %v674_v9  ;;  %s944_s7 = sshll.u32 %s1534_s6, 6  ;;  %s1521_s24 = smov %s1534_s6 }
  0xe2   : >> { %s681_s23 = scalar_lea.vmem %s1355_s13, %s944_s7 [#allocation3]   ;;  %s682_s18 = scalar_lea.vmem %s1456_s28, %s944_s7  }
  0xe5 PF: > { %s1492_s8 = sand.u32 7, %s1532_s21   ;;  %s958_s9 = sshll.u32 %s1462_s30, 6 }
  0xe6   : > { %s687_s10 = scalar_lea.vmem %s1355_s13, %s958_s9 [#allocation3]   ;;  %s689_s11 = scalar_lea.vmem %s1456_s28, %s958_s9  }
  0xe7   : > { %p949_p7 = scmp.le.s32.totalorder %s1492_s8, 0 }
  0xe8   : > { %s1251_s15 = smov (!%p949_p7), %s689_s11   ;;  %s1255_s17 = smov (!%p949_p7), %s687_s10  }
  0xe9   : > { %859 = sbr.rel (%p949_p7) target bundleno = 246 (0xf6), region = 227  ;;  %s1259_s20 = smov (!%p949_p7), 0  }
  0xea   : > { %s1263_s14 = smov (!%p949_p7), 0  }
  0xee LB: >> { %v699_v10 = vld [vmem:[%s1257_s17] sm:$0xff]  ;;  %s701_s12 = sadd.s32 1, %s1261_s20  ;;  %s693_s14 = sadd.s32 1, %s1265_s14   ;;  %s1265_s14 = sphi %s1263_s14, %s693_s14   ;;  %s1261_s20 = sphi %s1259_s20, %s1260_s20   ;;  %s1257_s17 = sphi %s1255_s17, %s706_s17   ;;  %s1253_s15 = sphi %s1251_s15, %s707_s15  }
  0xef   : >> { %700 = vst [vmem:[%s1253_s15] sm:$0xff] %v699_v10  ;;  %p702_p8 = scmp.ge.s32.totalorder %s701_s12, %s1492_s8  ;;  %p692_p9 = scmp.ge.s32.totalorder %s693_s14, %s1492_s8 }
  0xf1   : >> { %s1536_s12 = smov (%p702_p8, %s701_s12), 0  ;;  %695 = sbr.rel (!%p692_p9) target bundleno = 238 (0xee), region = 233 }
  0xf2   : >> { %s950_s13 = sshll.u32 %s1536_s12, 3  ;;  %s1260_s20 = smov %s1536_s12  }
  0xf3   : >> { %s706_s17 = scalar_lea.vmem %s687_s10, %s950_s13 [#allocation3]   ;;  %s707_s15 = scalar_lea.vmem %s689_s11, %s950_s13  }
  0xf6 PF: > { %p12_p10 = scmp.ge.s32.totalorder %s1308_s19, 4   ;;  %s1522_s15 = smov %s1197_s16 }
  0xf7   : > { %s1523_s16 = smov %s1316_s22  ;;  %s1524_s17 = smov %s1308_s19 }
  0xf8   :  { %14 = sbr.rel (!%p12_p10) target bundleno = 2 (0x2), region = 244 }

</bundles_post_ra>
